<compile_context>
chip_gen: v7x
topology: tpu7x:2x2x1
jax: 0.10.0
libtpu: 0.0.40
codegen_flags: <defaults>
</compile_context>

<pallas_src>
import jax
import jax.numpy as jnp
from jax.experimental import pallas as pl
from jax.experimental.pallas import tpu as pltpu

# config-equivalent constants (stand-ins for `config.begin` / `config.end`)
VOCAB_BEGIN = 16
VOCAB_END = 48
NEG_FILL = -1e18             # masked_fill value (matches the PyTorch module)
NEG_FILL_PAD = -1e30         # vocab-padding columns: strictly below NEG_FILL
VMEM_LIMIT_BYTES = 48 * 1024 * 1024        # v7x-safe (64 MiB VMEM); raise to ~96 MiB on v5e/v6e
NON_STASH_VMEM_BUDGET = 20 * 1024 * 1024   # budget for double-buffered W/x/out/mask tiles


def _cdiv(a, b):
    return -(-a // b)


def _round_up(n, m):
    return _cdiv(n, m) * m


# --------------------------------------------------------------------------------------
# kernels
# --------------------------------------------------------------------------------------
def _masked_logits(x_ref, w_ref, mask_ref, bias_ref):
    """x @ W (bf16 in, f32 accumulate on the MXU), + bias, exact masked_fill."""
    logits = jnp.dot(x_ref[...], w_ref[...], preferred_element_type=jnp.float32)
    return jnp.where(mask_ref[...] != 0.0, jnp.float32(NEG_FILL),
                     logits + bias_ref[...])


def _logsoftmax_stash_kernel(x_ref, w_ref, mask_ref, bias_ref, o_ref,
                             stash_ref, m_sc, l_sc, lse_sc):
    """grid = (row_tiles, 2, v_tiles).

    phase 0: project + mask one vocab tile, stash it into VMEM, update running (max, sum).
    phase 1: reload the stashed tile and write the normalised log-probs.
             (no matmul, and the W BlockSpec is parked -> no W re-stream)
    """
    phase = pl.program_id(1)
    vj = pl.program_id(2)

    @pl.when(jnp.logical_and(phase == 0, vj == 0))
    def _():
        m_sc[...] = jnp.full(m_sc.shape, -jnp.inf, dtype=jnp.float32)
        l_sc[...] = jnp.zeros(l_sc.shape, dtype=jnp.float32)

    @pl.when(phase == 0)
    def _():
        masked = _masked_logits(x_ref, w_ref, mask_ref, bias_ref)
        stash_ref[vj] = masked.astype(stash_ref.dtype)
        m_prev = m_sc[...]
        m_new = jnp.maximum(m_prev, jnp.max(masked, axis=-1, keepdims=True))
        l_sc[...] = (l_sc[...] * jnp.exp(m_prev - m_new)
                     + jnp.sum(jnp.exp(masked - m_new), axis=-1, keepdims=True))
        m_sc[...] = m_new

    @pl.when(jnp.logical_and(phase == 1, vj == 0))
    def _():
        # log-sum-exp computed once per row tile, not once per vocab tile
        lse_sc[...] = m_sc[...] + jnp.log(l_sc[...])

    @pl.when(phase == 1)
    def _():
        o_ref[...] = (stash_ref[vj].astype(jnp.float32) - lse_sc[...]).astype(o_ref.dtype)


def _logsoftmax_recompute_kernel(x_ref, w_ref, mask_ref, bias_ref, o_ref,
                                 m_sc, l_sc, lse_sc):
    """Fallback when even a bf16 (tm x v_pad) stash does not fit VMEM: the masked
    logits are recomputed in phase 1 (W is streamed twice per row tile)."""
    phase = pl.program_id(1)
    vj = pl.program_id(2)

    masked = _masked_logits(x_ref, w_ref, mask_ref, bias_ref)

    @pl.when(jnp.logical_and(phase == 0, vj == 0))
    def _():
        m_sc[...] = jnp.full(m_sc.shape, -jnp.inf, dtype=jnp.float32)
        l_sc[...] = jnp.zeros(l_sc.shape, dtype=jnp.float32)

    @pl.when(phase == 0)
    def _():
        m_prev = m_sc[...]
        m_new = jnp.maximum(m_prev, jnp.max(masked, axis=-1, keepdims=True))
        l_sc[...] = (l_sc[...] * jnp.exp(m_prev - m_new)
                     + jnp.sum(jnp.exp(masked - m_new), axis=-1, keepdims=True))
        m_sc[...] = m_new

    @pl.when(jnp.logical_and(phase == 1, vj == 0))
    def _():
        lse_sc[...] = m_sc[...] + jnp.log(l_sc[...])

    @pl.when(phase == 1)
    def _():
        o_ref[...] = (masked - lse_sc[...]).astype(o_ref.dtype)


def _proj_slab_kernel(x_ref, w_ref, b_ref, o_ref):
    """rows of x -> x @ W_slab + b_slab (aspect branch, only the [begin, end) slab)."""
    logits = jnp.dot(x_ref[...], w_ref[...], preferred_element_type=jnp.float32)
    o_ref[...] = (logits + b_ref[...]).astype(o_ref.dtype)


# --------------------------------------------------------------------------------------
# tiling helpers / one-time parameter preparation
# --------------------------------------------------------------------------------------
def _pick_tile_v(H, V, tm, vmem_limit_bytes):
    """Largest vocab tile keeping all double-buffered residents (W, x, out, mask/bias)
    inside the non-stash VMEM budget; prefers tiles that divide V (no padding and no
    post-kernel slice) and that are 256-aligned (full MXU N passes)."""
    budget = min(NON_STASH_VMEM_BUDGET, vmem_limit_bytes // 2)
    fixed = 2 * tm * H * 2                            # x tile (bf16, double buffered)
    per_tv = 2 * (H * 2 + tm * 4 + 2 * 4)             # W(bf16) + out(f32) + mask/bias(f32)
    cap = max(128, (budget - fixed) // per_tv)
    cap = max(128, cap // 128 * 128)
    cap = min(cap, _round_up(V, 128))
    if V % 128 == 0:
        divisors = [d for d in range(128, min(cap, V) + 1, 128) if V % d == 0]
        if divisors:
            div256 = [d for d in divisors if d % 256 == 0]
            return max(div256) if div256 else max(divisors)
    if cap >= 256:
        cap = cap // 256 * 256
    return cap


def _row_tiling(BL, tile_m):
    if BL <= tile_m:
        tm = max(8, _round_up(BL, 8))
    else:
        # >= 2 row tiles so the 'parallel' row axis can shard across both v7x
        # TensorCores, sized to keep row padding minimal (no round-up-to-512 blowup).
        tm = min(tile_m, max(8, _round_up(_cdiv(BL, 2), 8)))
    r_pad = _round_up(BL, tm)
    return tm, r_pad, r_pad // tm


def make_generator_params(w, b, word_mask, *, tile_m=256, tile_v=None,
                          vmem_limit_bytes=VMEM_LIMIT_BYTES,
                          begin=VOCAB_BEGIN, end=VOCAB_END):
    """One-time weight preparation (hoisted out of the per-call forward):
    bf16 cast, vocab padding, mask/bias tiles and the aspect slab.

    w: (H, V) float32 (PyTorch Linear.weight.T), b: (V,), word_mask: (V,) 0/1.
    """
    H, V = w.shape
    w_bf = w.astype(jnp.bfloat16)

    # ---- log_softmax branch tensors --------------------------------------------------
    if tile_v is None:
        tv = _pick_tile_v(H, V, tile_m, vmem_limit_bytes)
    else:
        tv = max(128, min(_round_up(tile_v, 128), _round_up(V, 128)))
    v_pad = _round_up(V, tv)

    mask_f = word_mask.astype(jnp.float32).reshape(1, V)
    bias_f = b.astype(jnp.float32).reshape(1, V)
    w_pad = w_bf
    if v_pad != V:
        w_pad = jnp.pad(w_bf, ((0, 0), (0, v_pad - V)))
        mask_f = jnp.pad(mask_f, ((0, 0), (0, v_pad - V)))                   # pad: unmasked
        bias_f = jnp.pad(bias_f, ((0, 0), (0, v_pad - V)),
                         constant_values=NEG_FILL_PAD)                       # pad: -1e30

    # ---- aspect branch: only the 128-lane slab covering [begin, end) -----------------
    slab_start = (begin // 128) * 128
    slab_end = min(_round_up(end, 128), V)
    w_slab = w_bf[:, slab_start:slab_end]
    b_slab = b[slab_start:slab_end].astype(jnp.float32).reshape(1, slab_end - slab_start)

    return dict(H=H, V=V, tile_m=tile_m, tile_v=tv,
                vmem_limit_bytes=vmem_limit_bytes, begin=begin, end=end,
                w_pad=w_pad, mask_pad=mask_f, bias_pad=bias_f,
                w_slab=w_slab, b_slab=b_slab, slab_start=slab_start)


# --------------------------------------------------------------------------------------
# forward
# --------------------------------------------------------------------------------------
def generator_forward(x, params, is_generate_aspect, batch_output_word=None,
                      is_greedy=False, max_stash_bytes=None):
    """JAX/Pallas port of Generator.forward.  x: (B, L, H) float32,
    params: output of make_generator_params (weights prepared once, not per call)."""
    H, V = params["H"], params["V"]
    B, L, _ = x.shape

    if is_greedy and not is_generate_aspect:
        # only the last position's scores are consumed downstream: project B rows.
        x = x[:, L - 1:L, :]
        L = 1

    BL = B * L
    tm, r_pad, grid_rows = _row_tiling(BL, params["tile_m"])

    x2 = x.reshape(BL, H).astype(jnp.bfloat16)
    if r_pad != BL:
        x2 = jnp.pad(x2, ((0, r_pad - BL), (0, 0)))

    vmem_limit = params["vmem_limit_bytes"]

    if is_generate_aspect:
        w_slab, b_slab = params["w_slab"], params["b_slab"]
        sw = w_slab.shape[1]
        pro = pl.pallas_call(
            _proj_slab_kernel,
            out_shape=jax.ShapeDtypeStruct((r_pad, sw), jnp.float32),
            grid_spec=pltpu.PrefetchScalarGridSpec(
                num_scalar_prefetch=0,
                grid=(grid_rows,),
                in_specs=[
                    pl.BlockSpec((tm, H), lambda i: (i, 0)),
                    pl.BlockSpec((H, sw), lambda i: (0, 0)),
                    pl.BlockSpec((1, sw), lambda i: (0, 0)),
                ],
                out_specs=pl.BlockSpec((tm, sw), lambda i: (i, 0)),
            ),
            compiler_params=pltpu.CompilerParams(
                dimension_semantics=("parallel",),
                vmem_limit_bytes=vmem_limit),
        )(x2, w_slab, b_slab)

        pro = (pro if r_pad == BL else pro[:BL]).reshape(B, L, sw)
        lo = params["begin"] - params["slab_start"]
        hi = params["end"] - params["slab_start"]
        logit = pro[:, :, lo:hi]
        if L == 1:   # torch .squeeze(dim=1) only removes the dim if it is 1
            logit = jnp.squeeze(logit, axis=1)
        return logit

    # ---- masked log_softmax branch ----------------------------------------------------
    w_pad, mask_pad, bias_pad = params["w_pad"], params["mask_pad"], params["bias_pad"]
    tv = params["tile_v"]
    v_pad = w_pad.shape[1]
    grid_v = v_pad // tv

    # choose the phase-1 strategy: stash the row-tile's masked logits in VMEM (skips the
    # phase-1 matmul and halves W HBM streaming) whenever the stash fits the budget.
    non_stash = 2 * (tm * H * 2 + H * tv * 2 + tm * tv * 4 + 2 * tv * 4) + 3 * tm * 4
    if max_stash_bytes is None:
        max_stash_bytes = max(0, vmem_limit - non_stash - (4 << 20))  # 4 MiB headroom
    if grid_v * tm * tv * 4 <= max_stash_bytes:
        stash_dtype = jnp.float32
    elif grid_v * tm * tv * 2 <= max_stash_bytes:
        stash_dtype = jnp.bfloat16     # large-V case; bf16 log-prob precision
    else:
        stash_dtype = None             # recompute fallback
        # TODO(synk): for very large V a 2-pallas_call split (bf16 logits round-tripped
        # via HBM) beats the recompute whenever tm < H; not implemented here.

    common = dict(
        out_shape=jax.ShapeDtypeStruct((r_pad, v_pad), jnp.float32),
        compiler_params=pltpu.CompilerParams(
            dimension_semantics=("parallel", "arbitrary", "arbitrary"),
            vmem_limit_bytes=vmem_limit),
    )
    x_spec = pl.BlockSpec((tm, H), lambda i, p, j: (i, 0))
    # phase 0 parks the output block at (i, 0) (never written there);
    # phase 1 walks (i, 0..grid_v-1) writing the normalised tiles.
    out_spec = pl.BlockSpec((tm, tv), lambda i, p, j: (i, j * p))
    row_scratch = [pltpu.VMEM((tm, 1), jnp.float32)] * 3   # m, l, lse

    if stash_dtype is not None:
        def park_map(i, p, j, _last=grid_v - 1):
            # phase 0 streams vocab tiles; phase 1 parks on the last tile so W /
            # mask / bias are NOT re-fetched from HBM during normalisation.
            return (0, j * (1 - p) + _last * p)

        out = pl.pallas_call(
            _logsoftmax_stash_kernel,
            grid_spec=pltpu.PrefetchScalarGridSpec(
                num_scalar_prefetch=0,
                grid=(grid_rows, 2, grid_v),
                in_specs=[x_spec,
                          pl.BlockSpec((H, tv), park_map),
                          pl.BlockSpec((1, tv), park_map),
                          pl.BlockSpec((1, tv), park_map)],
                out_specs=out_spec,
                scratch_shapes=[pltpu.VMEM((grid_v, tm, tv), stash_dtype)] + row_scratch,
            ),
            **common,
        )(x2, w_pad, mask_pad, bias_pad)
    else:
        out = pl.pallas_call(
            _logsoftmax_recompute_kernel,
            grid_spec=pltpu.PrefetchScalarGridSpec(
                num_scalar_prefetch=0,
                grid=(grid_rows, 2, grid_v),
                in_specs=[x_spec,
                          pl.BlockSpec((H, tv), lambda i, p, j: (0, j)),
                          pl.BlockSpec((1, tv), lambda i, p, j: (0, j)),
                          pl.BlockSpec((1, tv), lambda i, p, j: (0, j))],
                out_specs=out_spec,
                scratch_shapes=row_scratch,
            ),
            **common,
        )(x2, w_pad, mask_pad, bias_pad)

    if r_pad == BL and v_pad == V:
        logit = out.reshape(B, L, V)        # no post-kernel slice / extra HBM pass
    else:
        logit = out[:BL, :V].reshape(B, L, V)

    if is_greedy:
        # x was pre-sliced to the last position, so L == 1 here.
        logit = logit[:, 0, :]
        # TODO(synk): NoRepeatNGramLogitsProcessor.get_scores (n-gram banning on
        # batch_output_word) is defined outside the provided module; not implemented.
    return logit


# --------------------------------------------------------------------------------------
if __name__ == "__main__":
    # small shapes consistent with "x: bs * length * hidden";
    # L=7 exercises row padding, tile_v=128 forces 2 vocab tiles (online softmax path).
    B, L, H, V = 2, 7, 32, 256

    key = jax.random.PRNGKey(0)
    kx, kw, kb = jax.random.split(key, 3)
    x = jax.random.normal(kx, (B, L, H), dtype=jnp.float32)
    w = jax.random.normal(kw, (H, V), dtype=jnp.float32) * 0.05   # Linear.weight.T
    b = jax.random.normal(kb, (V,), dtype=jnp.float32) * 0.01

    idx = jnp.arange(V)
    word_mask = ((idx >= VOCAB_BEGIN) & (idx < VOCAB_END)).astype(jnp.int32)

    # weights are prepared (bf16 cast / pad / mask folding / aspect slab) ONCE here
    params_auto = make_generator_params(w, b, word_mask)              # tv = 256 (1 vocab tile)
    params_128 = make_generator_params(w, b, word_mask, tile_v=128)   # forces 2 vocab tiles

    # pure-JAX reference using the same bf16-input / f32-accumulate matmul
    pro_ref = jnp.einsum("blh,hv->blv",
                         x.astype(jnp.bfloat16), w.astype(jnp.bfloat16),
                         preferred_element_type=jnp.float32) + b
    masked_ref = jnp.where(word_mask.astype(bool), jnp.float32(NEG_FILL), pro_ref)
    ls_ref = jax.nn.log_softmax(masked_ref, axis=-1)

    # 1) main branch: multi-tile online softmax, f32 VMEM stash (no phase-1 matmul)
    logit = jax.block_until_ready(generator_forward(x, params_128, is_generate_aspect=False))
    assert logit.shape == (B, L, V)
    assert jnp.allclose(logit, ls_ref, atol=1e-3, rtol=1e-3), "log_softmax mismatch"

    # 2) main branch: auto tile (single vocab tile, no padding / no post-kernel slice)
    logit_auto = jax.block_until_ready(
        generator_forward(x, params_auto, is_generate_aspect=False))
    assert jnp.allclose(logit_auto, ls_ref, atol=1e-3, rtol=1e-3), "auto-tile mismatch"

    # 3) main branch: forced recompute fallback (stash disabled)
    logit_rc = jax.block_until_ready(
        generator_forward(x, params_128, is_generate_aspect=False, max_stash_bytes=0))
    assert jnp.allclose(logit_rc, ls_ref, atol=1e-3, rtol=1e-3), "recompute mismatch"

    # 4) main branch: forced bf16 stash (budget between bf16 and f32 stash sizes)
    logit_bf = jax.block_until_ready(
        generator_forward(x, params_128, is_generate_aspect=False,
                          max_stash_bytes=12 * 1024))
    assert jnp.allclose(logit_bf, ls_ref, atol=3e-2, rtol=3e-2), "bf16-stash mismatch"

    # 5) aspect branch: raw projected logits sliced to [begin, end)
    aspect_logit = jax.block_until_ready(
        generator_forward(x, params_auto, is_generate_aspect=True))
    assert aspect_logit.shape == (B, L, VOCAB_END - VOCAB_BEGIN)
    assert jnp.allclose(aspect_logit, pro_ref[:, :, VOCAB_BEGIN:VOCAB_END],
                        atol=1e-3, rtol=1e-3), "aspect mismatch"

    # 6) greedy branch: only the last position is projected
    greedy_logit = jax.block_until_ready(
        generator_forward(x, params_128, is_generate_aspect=False, is_greedy=True))
    assert greedy_logit.shape == (B, V)
    assert jnp.allclose(greedy_logit, ls_ref[:, -1, :], atol=1e-3, rtol=1e-3), "greedy mismatch"

    print("KERNEL_OK")
</pallas_src>

<mosaic_0001>
module attributes {stable_mosaic.version = 11 : i64} {
  func.func @_logsoftmax_stash_kernel(%arg0: i32, %arg1: i32, %arg2: i32, %arg3: memref<16x32xbf16, #tpu.memory_space<vmem>>, %arg4: memref<32x128xbf16, #tpu.memory_space<vmem>>, %arg5: memref<1x128xf32, #tpu.memory_space<vmem>>, %arg6: memref<1x128xf32, #tpu.memory_space<vmem>>, %arg7: memref<16x128xf32, #tpu.memory_space<vmem>>, %arg8: memref<2x16x128xf32, #tpu.memory_space<vmem>>, %arg9: memref<16x1xf32, #tpu.memory_space<vmem>>, %arg10: memref<16x1xf32, #tpu.memory_space<vmem>>, %arg11: memref<16x1xf32, #tpu.memory_space<vmem>>) attributes {dimension_semantics = [#tpu.dimension_semantics<parallel>, #tpu.dimension_semantics<arbitrary>, #tpu.dimension_semantics<arbitrary>], iteration_bounds = array<i64: 1, 2, 2>, scalar_prefetch = 0 : i64, scratch_operands = 4 : i64, tpu.core_type = #tpu.core_type<tc>, window_params = [{transform_indices = @transform_0, window_bounds = array<i64: 16, 32>}, {transform_indices = @transform_1, window_bounds = array<i64: 32, 128>}, {transform_indices = @transform_2, window_bounds = array<i64: 1, 128>}, {transform_indices = @transform_3, window_bounds = array<i64: 1, 128>}, {transform_indices = @transform_4, window_bounds = array<i64: 16, 128>}]} {
    %c0_i32 = arith.constant 0 : i32
    %0 = arith.cmpi eq, %arg1, %c0_i32 : i32
    %c0_i32_0 = arith.constant 0 : i32
    %1 = arith.cmpi eq, %arg2, %c0_i32_0 : i32
    %2 = arith.andi %0, %1 : i1
    %3 = arith.extui %2 : i1 to i32
    %c0_i32_1 = arith.constant 0 : i32
    %4 = arith.cmpi ne, %3, %c0_i32_1 : i32
    scf.if %4 {
      %cst = arith.constant 0xFF800000 : f32
      %16 = vector.broadcast %cst : f32 to vector<16x1xf32>
      %c0 = arith.constant 0 : index
      %c0_8 = arith.constant 0 : index
      %17 = vector.load %arg9[%c0, %c0_8] : memref<16x1xf32, #tpu.memory_space<vmem>>, vector<16x1xf32>
      tpu.vector_store %arg9[%c0, %c0_8], %16 {strides = array<i32>} : memref<16x1xf32, #tpu.memory_space<vmem>>, vector<16x1xf32>,
      %cst_9 = arith.constant 0.000000e+00 : f32
      %18 = vector.broadcast %cst_9 : f32 to vector<16x1xf32>
      %c0_10 = arith.constant 0 : index
      %c0_11 = arith.constant 0 : index
      %19 = vector.load %arg10[%c0_10, %c0_11] : memref<16x1xf32, #tpu.memory_space<vmem>>, vector<16x1xf32>
      tpu.vector_store %arg10[%c0_10, %c0_11], %18 {strides = array<i32>} : memref<16x1xf32, #tpu.memory_space<vmem>>, vector<16x1xf32>,
    } else {
    }
    %c0_i32_2 = arith.constant 0 : i32
    %5 = arith.cmpi eq, %arg1, %c0_i32_2 : i32
    %6 = arith.extui %5 : i1 to i32
    %c0_i32_3 = arith.constant 0 : i32
    %7 = arith.cmpi ne, %6, %c0_i32_3 : i32
    scf.if %7 {
      %c0 = arith.constant 0 : index
      %c0_8 = arith.constant 0 : index
      %16 = vector.load %arg3[%c0, %c0_8] : memref<16x32xbf16, #tpu.memory_space<vmem>>, vector<16x32xbf16>
      %c0_9 = arith.constant 0 : index
      %c0_10 = arith.constant 0 : index
      %17 = vector.load %arg4[%c0_9, %c0_10] : memref<32x128xbf16, #tpu.memory_space<vmem>>, vector<32x128xbf16>
      %cst = arith.constant dense<0.000000e+00> : vector<16x128xf32>
      %18 = tpu.matmul %16, %17, %cst {dimension_numbers = #tpu.dot_dimension_numbers<[1], [0], [0], [1], [0, 0, 1, 1], [], []>} : vector<16x32xbf16>, vector<32x128xbf16>, vector<16x128xf32> -> vector<16x128xf32>
      %c0_11 = arith.constant 0 : index
      %c0_12 = arith.constant 0 : index
      %19 = vector.load %arg5[%c0_11, %c0_12] : memref<1x128xf32, #tpu.memory_space<vmem>>, vector<1x128xf32>
      %cst_13 = arith.constant 0.000000e+00 : f32
      %20 = vector.broadcast %cst_13 : f32 to vector<1x128xf32>
      %21 = arith.cmpf one, %19, %20 : vector<1x128xf32>
      %c0_14 = arith.constant 0 : index
      %c0_15 = arith.constant 0 : index
      %22 = vector.load %arg6[%c0_14, %c0_15] : memref<1x128xf32, #tpu.memory_space<vmem>>, vector<1x128xf32>
      %23 = vector.broadcast %22 : vector<1x128xf32> to vector<16x128xf32>
      %24 = arith.addf %18, %23 : vector<16x128xf32>
      %cst_16 = arith.constant -9.99999984E+17 : f32
      %25 = vector.shape_cast %21 : vector<1x128xi1> to vector<1x128xi1>
      %26 = vector.broadcast %25 : vector<1x128xi1> to vector<16x128xi1>
      %27 = vector.broadcast %cst_16 : f32 to vector<16x128xf32>
      %28 = arith.select %26, %27, %24 : vector<16x128xi1>, vector<16x128xf32>
      %29 = arith.index_cast %arg2 : i32 to index
      %c0_17 = arith.constant 0 : index
      %c0_18 = arith.constant 0 : index
      %30 = vector.load %arg8[%29, %c0_17, %c0_18] : memref<2x16x128xf32, #tpu.memory_space<vmem>>, vector<1x16x128xf32>
      %31 = vector.shape_cast %30 : vector<1x16x128xf32> to vector<16x128xf32>
      %32 = vector.shape_cast %28 : vector<16x128xf32> to vector<1x16x128xf32>
      tpu.vector_store %arg8[%29, %c0_17, %c0_18], %32 {strides = array<i32>} : memref<2x16x128xf32, #tpu.memory_space<vmem>>, vector<1x16x128xf32>,
      %c0_19 = arith.constant 0 : index
      %c0_20 = arith.constant 0 : index
      %33 = vector.load %arg9[%c0_19, %c0_20] : memref<16x1xf32, #tpu.memory_space<vmem>>, vector<16x1xf32>
      %cst_21 = arith.constant dense<0xFF800000> : vector<16xf32>
      %34 = vector.multi_reduction <maximumf>, %28, %cst_21 [1] : vector<16x128xf32> to vector<16xf32>
      %35 = vector.shape_cast %34 : vector<16xf32> to vector<16x1xf32>
      %36 = arith.maximumf %33, %35 : vector<16x1xf32>
      %c0_22 = arith.constant 0 : index
      %c0_23 = arith.constant 0 : index
      %37 = vector.load %arg10[%c0_22, %c0_23] : memref<16x1xf32, #tpu.memory_space<vmem>>, vector<16x1xf32>
      %38 = arith.subf %33, %36 : vector<16x1xf32>
      %39 = math.exp %38 : vector<16x1xf32>
      %40 = arith.mulf %37, %39 : vector<16x1xf32>
      %41 = vector.broadcast %36 : vector<16x1xf32> to vector<16x128xf32>
      %42 = arith.subf %28, %41 : vector<16x128xf32>
      %43 = math.exp %42 : vector<16x128xf32>
      %cst_24 = arith.constant dense<0.000000e+00> : vector<16xf32>
      %44 = vector.multi_reduction <add>, %43, %cst_24 [1] : vector<16x128xf32> to vector<16xf32>
      %45 = vector.shape_cast %44 : vector<16xf32> to vector<16x1xf32>
      %46 = arith.addf %40, %45 : vector<16x1xf32>
      %c0_25 = arith.constant 0 : index
      %c0_26 = arith.constant 0 : index
      %47 = vector.load %arg10[%c0_25, %c0_26] : memref<16x1xf32, #tpu.memory_space<vmem>>, vector<16x1xf32>
      tpu.vector_store %arg10[%c0_25, %c0_26], %46 {strides = array<i32>} : memref<16x1xf32, #tpu.memory_space<vmem>>, vector<16x1xf32>,
      %c0_27 = arith.constant 0 : index
      %c0_28 = arith.constant 0 : index
      %48 = vector.load %arg9[%c0_27, %c0_28] : memref<16x1xf32, #tpu.memory_space<vmem>>, vector<16x1xf32>
      tpu.vector_store %arg9[%c0_27, %c0_28], %36 {strides = array<i32>} : memref<16x1xf32, #tpu.memory_space<vmem>>, vector<16x1xf32>,
    } else {
    }
    %c1_i32 = arith.constant 1 : i32
    %8 = arith.cmpi eq, %arg1, %c1_i32 : i32
    %c0_i32_4 = arith.constant 0 : i32
    %9 = arith.cmpi eq, %arg2, %c0_i32_4 : i32
    %10 = arith.andi %8, %9 : i1
    %11 = arith.extui %10 : i1 to i32
    %c0_i32_5 = arith.constant 0 : i32
    %12 = arith.cmpi ne, %11, %c0_i32_5 : i32
    scf.if %12 {
      %c0 = arith.constant 0 : index
      %c0_8 = arith.constant 0 : index
      %16 = vector.load %arg9[%c0, %c0_8] : memref<16x1xf32, #tpu.memory_space<vmem>>, vector<16x1xf32>
      %c0_9 = arith.constant 0 : index
      %c0_10 = arith.constant 0 : index
      %17 = vector.load %arg10[%c0_9, %c0_10] : memref<16x1xf32, #tpu.memory_space<vmem>>, vector<16x1xf32>
      %18 = math.log %17 : vector<16x1xf32>
      %19 = arith.addf %16, %18 : vector<16x1xf32>
      %c0_11 = arith.constant 0 : index
      %c0_12 = arith.constant 0 : index
      %20 = vector.load %arg11[%c0_11, %c0_12] : memref<16x1xf32, #tpu.memory_space<vmem>>, vector<16x1xf32>
      tpu.vector_store %arg11[%c0_11, %c0_12], %19 {strides = array<i32>} : memref<16x1xf32, #tpu.memory_space<vmem>>, vector<16x1xf32>,
    } else {
    }
    %c1_i32_6 = arith.constant 1 : i32
    %13 = arith.cmpi eq, %arg1, %c1_i32_6 : i32
    %14 = arith.extui %13 : i1 to i32
    %c0_i32_7 = arith.constant 0 : i32
    %15 = arith.cmpi ne, %14, %c0_i32_7 : i32
    scf.if %15 {
      %16 = arith.index_cast %arg2 : i32 to index
      %c0 = arith.constant 0 : index
      %c0_8 = arith.constant 0 : index
      %17 = vector.load %arg8[%16, %c0, %c0_8] : memref<2x16x128xf32, #tpu.memory_space<vmem>>, vector<1x16x128xf32>
      %18 = vector.shape_cast %17 : vector<1x16x128xf32> to vector<16x128xf32>
      %c0_9 = arith.constant 0 : index
      %c0_10 = arith.constant 0 : index
      %19 = vector.load %arg11[%c0_9, %c0_10] : memref<16x1xf32, #tpu.memory_space<vmem>>, vector<16x1xf32>
      %20 = vector.broadcast %19 : vector<16x1xf32> to vector<16x128xf32>
      %21 = arith.subf %18, %20 : vector<16x128xf32>
      %c0_11 = arith.constant 0 : index
      %c0_12 = arith.constant 0 : index
      %22 = vector.load %arg7[%c0_11, %c0_12] : memref<16x128xf32, #tpu.memory_space<vmem>>, vector<16x128xf32>
      tpu.vector_store %arg7[%c0_11, %c0_12], %21 {strides = array<i32>} : memref<16x128xf32, #tpu.memory_space<vmem>>, vector<16x128xf32>,
    } else {
    }
    return
  }
  func.func @transform_0(%arg0: i32, %arg1: i32, %arg2: i32) -> (i32, i32) {
    %c0_i32 = arith.constant 0 : i32
    %c0_i32_0 = arith.constant 0 : i32
    return %arg0, %c0_i32 : i32, i32
  }
  func.func @transform_1(%arg0: i32, %arg1: i32, %arg2: i32) -> (i32, i32) {
    %c1_i32 = arith.constant 1 : i32
    %0 = arith.subi %c1_i32, %arg1 : i32
    %1 = arith.muli %arg2, %0 : i32
    %c1_i32_0 = arith.constant 1 : i32
    %2 = arith.muli %c1_i32_0, %arg1 : i32
    %3 = arith.addi %1, %2 : i32
    %c0_i32 = arith.constant 0 : i32
    %c0_i32_1 = arith.constant 0 : i32
    return %c0_i32, %3 : i32, i32
  }
  func.func @transform_2(%arg0: i32, %arg1: i32, %arg2: i32) -> (i32, i32) {
    %c1_i32 = arith.constant 1 : i32
    %0 = arith.subi %c1_i32, %arg1 : i32
    %1 = arith.muli %arg2, %0 : i32
    %c1_i32_0 = arith.constant 1 : i32
    %2 = arith.muli %c1_i32_0, %arg1 : i32
    %3 = arith.addi %1, %2 : i32
    %c0_i32 = arith.constant 0 : i32
    %c0_i32_1 = arith.constant 0 : i32
    return %c0_i32, %3 : i32, i32
  }
  func.func @transform_3(%arg0: i32, %arg1: i32, %arg2: i32) -> (i32, i32) {
    %c1_i32 = arith.constant 1 : i32
    %0 = arith.subi %c1_i32, %arg1 : i32
    %1 = arith.muli %arg2, %0 : i32
    %c1_i32_0 = arith.constant 1 : i32
    %2 = arith.muli %c1_i32_0, %arg1 : i32
    %3 = arith.addi %1, %2 : i32
    %c0_i32 = arith.constant 0 : i32
    %c0_i32_1 = arith.constant 0 : i32
    return %c0_i32, %3 : i32, i32
  }
  func.func @transform_4(%arg0: i32, %arg1: i32, %arg2: i32) -> (i32, i32) {
    %0 = arith.muli %arg2, %arg1 : i32
    %c0_i32 = arith.constant 0 : i32
    return %arg0, %0 : i32, i32
  }
}

</mosaic_0001>

<bundles_post_ra>
// kernel: tpu_custom_call.1
= control target key start
LH: loop header
LB: loop body
LE: loop exit
PB: predicated region body
PF: predicated region fallthrough
CT: control target
= control target key end

     0   :  { %s1402_s0 = inlined_call_operand.hbm [shape: bf16[16,32], index: 0, kind: input, shape index: {}]   ;;  %s1403_s1 = inlined_call_operand.hbm [shape: bf16[32,256], index: 1, kind: input, shape index: {}]   ;;  %s1404_s2 = inlined_call_operand.vmem [shape: f32[1,256], index: 2, kind: input, shape index: {}]   ;;  %s1405_s3 = inlined_call_operand.vmem [shape: f32[1,256], index: 3, kind: input, shape index: {}]   ;;  %s1406_s4 = inlined_call_operand.hbm [shape: f32[16,256], index: 4, kind: output, shape index: {}]  }
   0x1   :  { %1424 = sst [smem:[#allocation21_spill]] %s1402_s0 }
   0x2   :  { %1425 = sst [smem:[#allocation22_spill]] %s1404_s2 }
   0x3   :  { %1426 = sst [smem:[#allocation23_spill]] %s1405_s3 }
   0x4   :  { %1427 = sst [smem:[#allocation24_spill]] %s1406_s4 }
   0x5   :  { %9 = vsyncpa [#allocation7], 0 }
   0x6   :  { %10 = vsyncpa [#allocation10], 0 }
   0x7   :  { %12 = vsyncpa [#allocation10 + $0x1], 0 }
   0x8   :  { %13 = vsyncpa [#allocation8], 0 }
   0x9   :  { %15 = vsyncpa [#allocation8 + $0x1], 0  ;;  %s1083_s15 = smov 0   ;;  %s1085_s16 = smov 0  }
   0xa   :  { %s1087_s17 = smov 0   ;;  %s1089_s18 = smov 0  }
   0xb   :  { %s1091_s19 = smov 0   ;;  %s1093_s20 = smov 0  }
   0xc   :  { %s1095_s21 = smov 0   ;;  %s1097_s22 = smov 0  }
   0xd   :  { %s1099_s23 = smov 0   ;;  %s1101_s24 = smov 0  }
   0xe   :  { %s1103_s25 = smov 0  }
   0xf LB: > { %1428 = sst [smem:[#allocation15_spill]] %s1001_s15  ;;  %s679_s26 = sadd.s32 4294967295, %s1041_s25   ;;  %s1041_s25 = sphi %s1103_s25, %s21_s25   ;;  %s1037_s24 = sphi %s1101_s24, %s1468_s24   ;;  %s1033_s23 = sphi %s1099_s23, %s1467_s23   ;;  %s1029_s22 = sphi %s1097_s22, %s1460_s22   ;;  %s1025_s21 = sphi %s1095_s21, %s1459_s21   ;;  %s1021_s20 = sphi %s1093_s20, %s1466_s20   ;;  %s1017_s19 = sphi %s1091_s19, %s1465_s19   ;;  %s1013_s18 = sphi %s1089_s18, %s1464_s18   ;;  %s1009_s17 = sphi %s1087_s17, %s1463_s17   ;;  %s1005_s16 = sphi %s1085_s16, %s1462_s16   ;;  %s1001_s15 = sphi %s1083_s15, %s1461_s15  }
  0x10   : > { %1429 = sst [smem:[#allocation16_spill]] %s1033_s23  ;;  %p86_p0 = scmp.ne.s32.totalorder %s1021_s20, %s1017_s19 }
  0x11   : > { %1430 = sst [smem:[#allocation17_spill]] %s1037_s24  ;;  %p87_p1 = scmp.eq.s32.totalorder %s1041_s25, 0 }
  0x12   : > { %1431 = sst [smem:[#allocation18_spill]] %s1041_s25  ;;  %p92_p2 = scmp.ne.s32.totalorder %s1017_s19, %s1013_s18 }
  0x13   : > { %p1141_p3 = scmp.eq.s32.totalorder %s679_s26, 0  ;;  %s680_s28 = sadd.s32 4294967294, %s1041_s25  }
  0x14   : > { %p1146_p4 = por %p87_p1, %p86_p0  ;;  %p183_p6 = scmp.ne.s32.totalorder %s1009_s17, %s1005_s16 }
  0x15   : > { %s1432_s27 = scalar_select %p1141_p3, 1, 0 }
  0x16   : > { %p1152_p5 = por %p1141_p3, %p92_p2  ;;  %p184_p7 = scmp.eq.s32.totalorder %s679_s26, 3 }
  0x17   : > { %p189_p8 = scmp.ne.s32.totalorder %s1005_s16, %s1001_s15  ;;  %p190_p9 = scmp.eq.s32.totalorder %s680_s28, 3 }
  0x18   : > { %s1434_s30 = scalar_select %p1152_p5, 1, 0 }
  0x19   : > { %p681_p10 = scmp.ge.s32.totalorder %s1041_s25, 1  ;;  %p1161_p11 = por %p184_p7, %p183_p6 }
  0x1a   : > { %p197_p12 = scmp.lt.s32.totalorder %s1041_s25, 5  ;;  %p1166_p13 = por %p190_p9, %p189_p8 }
  0x1b   : > { %s1435_s5 = scalar_select %p1161_p11, 1, 0 }
  0x1c   : > { %s1437_s6 = scalar_select %p1166_p13, 1, 0 }
  0x1d   : > { %1436 = sst [smem:[#allocation19_spill]] %s1435_s5  ;;  %p1170_p0 = pnand %p681_p10, %p197_p12 }
  0x1e   : > { %1438 = sst [smem:[#allocation20_spill]] %s1437_s6  ;;  %s1043_s8 = smov [#allocation6]  }
  0x1f   : > { %s1439_s7 = scalar_select %p1170_p0, 1, 0 }
  0x20   : > { %s212_s9 = sshll.u32 %s1043_s8, 4  ;;  %p722_p1 = pneg %p1170_p0  ;;  %s213_s9 = int_to_ptr.vmem [resolvable:$true] %s212_s9 }
  0x21   : > { %p735_p6 = scmp.lt.s32.totalorder %s1041_s25, 4  ;;  %s1442_s0 = sld [smem:[#allocation21_spill]] }
  0x22   : > { %p1178_p2 = pnand %p722_p1, %p1141_p3 }
  0x23   : > { %p1185_p7 = pnand %p735_p6, %p1146_p4 }
  0x24   : > { %p859_p9 = pneg %p1178_p2 }
  0x25   : > { %s1441_s11 = scalar_select %p1185_p7, 1, 0 }
  0x27   : > { %s857_s14 = scalar_lea.hbm %s1442_s0, 128 }
  0x28   : > { %p858_p8 = scmp.ne.s32.totalorder %s1442_s0, %s857_s14  ;;  %p864_p1 = scmp.lt.u32.totalorder %s857_s14, %s1442_s0 }
  0x2a   : > { %p860_p10 = pnand %p859_p9, %p858_p8 }
  0x2c   : > { %p861_p12 = pneg %p860_p10 }
  0x2e   : > { %p866_p4 = pnand %p864_p1, %p861_p12 }
  0x30   : > { %869 = shalt.err (!%p866_p4)
}
  0x31   : > { %s870_s29 = scalar_lea.vmem %s213_s9, 128  ;;  %p878_p5 = scmp.lt.s32.totalorder %s213_s9, %s213_s9 }
  0x32   : > { %p871_p6 = scmp.ne.s32.totalorder %s213_s9, %s870_s29  ;;  %p879_p3 = scmp.lt.s32.totalorder %s870_s29, %s870_s29 }
  0x34   : > { %p873_p13 = pnand %p871_p6, %p859_p9  ;;  %p880_p0 = por %p879_p3, %p878_p5 }
  0x36   : > { %p874_p11 = pneg %p873_p13 }
  0x38   : > { %p881_p7 = pnand %p880_p0, %p874_p11 }
  0x3a   : > { %884 = shalt.err (!%p881_p7)
}
  0x3b   : > { %s1420_s12 = smov 64   ;;  %s1421_s13 = smov 4  }
  0x3c   : > { %725 = dma.hbm_to_vmem [thread:$0]  (!%p1178_p2), %s1442_s0, 128, %s213_s9, [#allocation7], %s1420_s12, %s1420_s12, %s1421_s13  }
  0x3d   : > { %s173_s26 = sadd.s32 1, %s1009_s17  ;;  %s33_s28 = sadd.s32 1, %s1033_s23 }
  0x3e   : > { %s70_s8 = ssub.s32 1, %s1037_s24  ;;  %p34_p3 = scmp.ge.s32.totalorder %s33_s28, 2 }
  0x3f   : > { %s36_s29 = sadd.s32 1, %s1037_s24  ;;  %s71_s6 = smul.u32 %s1033_s23, %s70_s8 }
  0x40   : > { %s79_s15 = sadd.s32 1, %s1021_s20  ;;  %s1470_s28 = smov (%p34_p3, %s33_s28), 0 }
  0x41   : > { %s1472_s29 = smov (!%p34_p3, %s36_s29), %s1037_s24  ;;  %s166_s10 = smul.u32 %s1033_s23, %s1037_s24 }
  0x42   : > { %s226_s25 = sand.u32 1, %s1021_s20   ;;  %p38_p5 = scmp.ge.s32.totalorder %s1472_s29, 2 }
  0x43   : > { %s72_s4 = sadd.s32 %s1037_s24, %s71_s6  ;;  %s684_s5 = sshll.u32 %s226_s25, 4 }
  0x44   : > { %s1474_s29 = smov (%p38_p5, %s1472_s29), 0  ;;  %s685_s9 = sshll.u32 %s72_s4, 6 }
  0x45   : > { %s73_s14 = ssub.s32 1, %s1474_s29  ;;  %s167_s18 = smul.u32 %s1474_s29, %s1470_s28 }
  0x46   : > { %s74_s8 = smul.u32 %s73_s14, %s1470_s28  ;;  %s230_s12 = scalar_lea.vmem [#allocation9], %s684_s5 }
  0x47   : > { %s239_s13 = sshll.u32 %s230_s12, 4  ;;  %s169_s0 = ssub.s32 %s166_s10, %s167_s18  ;;  %s1233_s13 = int_to_ptr.vmem [resolvable:$true] %s239_s13 }
  0x48   : > { %s1230_s6 = scalar_lea.hbm %s1403_s1, %s685_s9  ;;  %s75_s24 = sadd.s32 %s74_s8, %s1474_s29 }
  0x49   : > { %p171_p11 = scmp.eq.s32.totalorder %s169_s0, 0  ;;  %s76_s2 = ssub.s32 %s72_s4, %s75_s24 }
  0x4a   : > { %p77_p13 = scmp.eq.s32.totalorder %s76_s2, 0  ;;  %s1241_s12 = scalar_lea.sflag [#allocation10], %s226_s25 }
  0x4b   : > { %s1236_s14 = scalar_select %p171_p11, %s1009_s17, %s173_s26  }
  0x4c   : > { %s1239_s5 = scalar_select %p77_p13, %s1021_s20, %s79_s15  }
  0x4d   : > { %s885_s10 = scalar_lea.hbm %s1230_s6, 256  ;;  %p1443_p2 = scmp.ne.s32.totalorder %s1441_s11, 0 }
  0x4e   : > { %p886_p0 = scmp.ne.s32.totalorder %s1230_s6, %s885_s10  ;;  %s890_s4 = scalar_lea.hbm %s1403_s1, 512 }
  0x4f   : > { %p887_p7 = pneg %p1443_p2  ;;  %p891_p10 = scmp.lt.u32.totalorder %s1230_s6, %s1403_s1 }
  0x50   : > { %p892_p12 = scmp.lt.u32.totalorder %s890_s4, %s885_s10  ;;  %p894_p4 = scmp.lt.u32.totalorder %s885_s10, %s1230_s6 }
  0x51   : > { %p888_p8 = pnand %p887_p7, %p886_p0 }
  0x52   : > { %p893_p1 = por %p892_p12, %p891_p10 }
  0x53   : > { %p889_p9 = pneg %p888_p8 }
  0x54   : > { %p895_p6 = por %p894_p4, %p893_p1 }
  0x56   : > { %p896_p3 = pnand %p895_p6, %p889_p9 }
  0x58   : > { %899 = shalt.err (!%p896_p3)
}
  0x59   : > { %s900_s15 = scalar_lea.vmem %s1233_s13, 256  ;;  %s1046_s24 = smov [#allocation9]  }
  0x5a   : > { %p901_p5 = scmp.ne.s32.totalorder %s1233_s13, %s900_s15  ;;  %s905_s25 = sshll.u32 %s1046_s24, 4  ;;  %s906_s25 = int_to_ptr.vmem [resolvable:$false] %s905_s25 }
  0x5b   : > { %s907_s26 = scalar_lea.vmem %s906_s25, 512  ;;  %p908_p0 = scmp.lt.s32.totalorder %s1233_s13, %s906_s25 }
  0x5c   : > { %p903_p11 = pnand %p901_p5, %p887_p7  ;;  %p909_p8 = scmp.lt.s32.totalorder %s907_s26, %s900_s15 }
  0x5e   : > { %p904_p13 = pneg %p903_p11  ;;  %p910_p10 = por %p909_p8, %p908_p0 }
  0x60   : > { %p911_p12 = pnand %p910_p10, %p904_p13 }
  0x62   : > { %914 = shalt.err (!%p911_p12)
}
  0x63   : > { %s1047_s9 = smov 128   ;;  %s1444_s18 = smov 4  }
  0x64   : > { %s1445_s8 = smov 64   ;;  %p1446_p7 = scmp.ne.s32.totalorder %s1439_s7, 0 }
  0x65   : > { %729 = dma.hbm_to_vmem [thread:$0]  (!%p1443_p2), %s1230_s6, 256, %s1233_s13, %s1241_s12, %s1047_s9, %s1445_s8, %s1444_s18  }
  0x66   : > { %275 = sbr.rel (%p1446_p7) target bundleno = 979 (0x3d3), region = 36  ;;  %p1447_p9 = scmp.ne.s32.totalorder (!%p1446_p7), %s1432_s27, 0 }
  0x6d   : > { %988 = dma.done.wait (%p1447_p9), [#allocation7], 128  }
  0x6e   : > { %990 = vsyncadd (%p1447_p9), [#allocation7], 4294967168  ;;  %s281_s10 = sand.u32 1, %s1017_s19   ;;  %p1448_p1 = scmp.ne.s32.totalorder %s1434_s30, 0 }
  0x6f   : > { %s1278_s0 = sshll.u32 %s281_s10, 4  ;;  %s282_s11 = scalar_lea.sflag [#allocation10], %s281_s10 }
  0x70   : > { %s285_s3 = scalar_lea.vmem [#allocation9], %s1278_s0 }
  0x71   : > { %992 = dma.done.wait (%p1448_p1), %s282_s11, 256  }
  0x72   : > { %994 = vsyncadd (%p1448_p1), %s282_s11, 4294967040  ;;  %s319_s27 = sand.u32 1, %s1005_s16   ;;  %s326_s7 = ssub.s32 1, %s1029_s22 }
  0x73   : > { %s689_s13 = sshll.u32 %s319_s27, 4  ;;  %s327_s6 = smul.u32 %s1025_s21, %s326_s7 }
  0x74   : > { %p347_p2 = scmp.eq.s32.totalorder %s1029_s22, 0  ;;  %p348_p4 = scmp.eq.s32.totalorder %s1025_s21, 0 }
  0x75   : > { %s328_s12 = sadd.s32 %s1029_s22, %s327_s6  ;;  %s1449_s23 = sld [smem:[#allocation22_spill]] }
  0x76   : > { %p329_p6 = scmp.lt.s32.totalorder %s328_s12, 1  ;;  %p349_p3 = pnand %p348_p4, %p347_p2 }
  0x77   : > { %s1450_s25 = sld [smem:[#allocation23_spill]]  ;;  %s1305_s9 = scalar_lea.vmem [#allocation11], %s689_s13  ;;  %vm353_vm0 = vcmask (!%p349_p3), 7168   ;;  %v1048_v0 = vmov (!%p349_p3), -inf   ;;  %v1049_v1 = vmov (!%p349_p3), 0.0  }
  0x78   : > { %s1476_s12 = smov (!%p329_p6, %s328_s12), 1  ;;  %352 = sbr.rel (%p349_p3) target bundleno = 127 (0x7f), region = 48 }
  0x79   : > { %354 = vst.msk [vmem:[#allocation3] sm:$0xff] (!%p349_p3), %vm353_vm0, %v1048_v0  ;;  %355 = vst.msk [vmem:[#allocation3 + $0x8] sm:$0xff] (!%p349_p3), %vm353_vm0, %v1048_v0 }
  0x7a   : > { %356 = vst.msk [vmem:[#allocation4] sm:$0xff] (!%p349_p3), %vm353_vm0, %v1049_v1  ;;  %357 = vst.msk [vmem:[#allocation4 + $0x8] sm:$0xff] (!%p349_p3), %vm353_vm0, %v1049_v1 }
  0x7b   : > { %s331_s2 = scalar_lea.vmem %s1449_s23, %s1476_s12 }
  0x7d   : > { %s340_s26 = scalar_lea.vmem %s1450_s25, %s1476_s12 }
  0x7f PF: > { %p690_p5 = scmp.ne.s32.totalorder %s1029_s22, 0 }
  0x80   : > { %v841_v2 = vld [vmem:[%s285_s3] sm:$0xff] (!%p690_p5)   ;;  %v1050_v3 = vmov (!%p690_p5), 0.0   ;;  %v842_v4 = vld [vmem:[%s285_s3 + $0x8] sm:$0xff] (!%p690_p5)   ;;  %vm1051_vm1 = vmmov (!%p690_p5), 0   ;;  %vm393_vm2 = vcmask (!%p690_p5), 261120   ;;  %v1052_v6 = vmov (!%p690_p5), 0  }
  0x81   : > { %360 = sbr.rel (%p690_p5) target bundleno = 788 (0x314), region = 52  ;;  %706 = vmatprep.subr.bf16.mxu0 (!%p690_p5), %v1050_v3  ;;  %710 = vmatprep.mubr.msk.bf16.mxu0 (!%p690_p5), %vm1051_vm1, %v1050_v3  ;;  %v843_v5 = vld [vmem:[#allocation6] sm:$0xff] (!%p690_p5)   ;;  %v439_v7 = vlaneseq (!%p690_p5)  ;;  %v367_v8 = vld [vmem:[%s331_s2] sm:$0x1] (!%p690_p5)  ;;  %s696_s0 = sshll.u32 (!%p690_p5), %s1025_s21, 4  ;;  %vm490_vm5 = vcmask (!%p690_p5), 7168  }
  0x82   : > { %707 = vmatpush3.bf16.msra.mxu0 (!%p690_p5), %v841_v2  ;;  %839 = vset.pattern.permute.xlu1 (!%p690_p5), %v1052_v6  ;;  %vm368_vm3 = vcmp.ne.f32.partialorder (!%p690_p5), %v367_v8, 0.0  ;;  %v691_v13 = vld [vmem:[%s340_s26] ss:$0 sm:$0xff] (!%p690_p5)  ;;  %s447_s11 = scalar_lea.vmem (!%p690_p5), [#allocation2], %s696_s0  ;;  %v451_v25 = vld [vmem:[#allocation3 + $0x8] sm:$0xff] (!%p690_p5)  ;;  %v458_v41 = vld [vmem:[#allocation4] sm:$0xff] (!%p690_p5) }
  0x83   : > { %708 = vmatprep.subr.bf16.mxu0 (!%p690_p5), %v1050_v3  ;;  %840 = vset.pattern.permute.xlu0 (!%p690_p5), %v1052_v6  ;;  %v440_v9 = vshrl.u32 (!%p690_p5), %v439_v7, 7  ;;  %v438_v11 = vsel (!%p690_p5), %vm368_vm3, 1, %v1052_v6  ;;  %v450_v22 = vld [vmem:[#allocation3] sm:$0xff] (!%p690_p5)  ;;  %v459_v45 = vld [vmem:[#allocation4 + $0x8] sm:$0xff] (!%p690_p5) }
  0x85   : > { %v441_v10 = vsub.s32 (!%p690_p5), 0, %v440_v9 }
  0x86   : > { %709 = vmatpush3.bf16.msra.mxu0 (!%p690_p5), %v842_v4 }
  0x87   : > { %v442_v12 = vrot.slane (!%p690_p5), %v438_v11, %v441_v10 }
  0x89   : > { %711 = vmatmul.mubr.msk.bf16.vlgmr.msra.gmra.mrb[0].mxu0 %vm393_vm2, %v843_v5  ;;  %vm443_vm4 = vcmp.eq.s32.totalorder %v442_v12, 1 }
 0x15c   : > { %v431_v14 = vpop.f32.mrb[0].mxu0 }
 0x15d   : > { %v432_v15 = vadd.f32 %v691_v13, %v431_v14  ;;  %v712_v16 = vpop.f32.mrb[1].mxu0 }
 0x15e   : > { %v434_v17 = vpop.f32.mrb[2].mxu0 }
 0x15f   : > { %v435_v18 = vadd.f32 %v691_v13, %v434_v17  ;;  %v713_v19 = vpop.f32.mrb[3].mxu0  ;;  %v444_v20 = vsel %vm443_vm4, -1e+18, %v432_v15 }
 0x160   : > { %452 = vmax.xlane.f32.xlu0 %v444_v20  ;;  %448 = vst [vmem:[%s447_s11] sm:$0xff] %v444_v20 }
 0x161   : > { %v445_v21 = vsel %vm443_vm4, -1e+18, %v435_v18 }
 0x162   : > { %449 = vst [vmem:[%s447_s11 + $0x8] sm:$0xff] %v445_v21 }
 0x164   : > { %454 = vmax.xlane.f32.xlu0 %v445_v21 }
 0x1ed   : > { %v453_v23 = vpop.xlane.xlu0 %452 }
 0x1ee   : > { %v456_v24 = vmax.f32 %v450_v22, %v453_v23 }
 0x1f0   : > { %v460_v26 = vsub.f32 %v450_v22, %v456_v24  ;;  %493 = vst.msk [vmem:[#allocation3] sm:$0xff] %vm490_vm5, %v456_v24  ;;  %470 = vperm.xlu1 %839, %v456_v24  }
 0x1f1   : > { %v455_v27 = vpop.xlane.xlu0 %454 }
 0x1f2   : > { %v457_v28 = vmax.f32 %v451_v25, %v455_v27  ;;  %v462_v38 = vmul.f32 1.442695, %v460_v26 }
 0x1f4   : > { %v461_v29 = vsub.f32 %v451_v25, %v457_v28  ;;  %494 = vst.msk [vmem:[#allocation3 + $0x8] sm:$0xff] %vm490_vm5, %v457_v28  ;;  %475 = vperm.xlu1 %839, %v457_v28  }
 0x1f6   : > { %v464_v39 = vmul.f32 1.442695, %v461_v29 }
 0x26f   : > { %v471_v30 = vpop.permute.xlu1 %470 }
 0x270   : > { %v478_v31 = vsub.f32 %v444_v20, %v471_v30 }
 0x272   : > { %v480_v32 = vmul.f32 1.442695, %v478_v31 }
 0x273   : > { %v476_v33 = vpop.permute.xlu1 %475 }
 0x274   : > { %844 = vpow2.f32 %v480_v32  ;;  %v479_v34 = vsub.f32 %v445_v21, %v476_v33 }
 0x276   : > { %v482_v35 = vmul.f32 1.442695, %v479_v34 }
 0x278   : > { %846 = vpow2.f32 %v482_v35 }
 0x279   : > { %848 = vpow2.f32 %v462_v38 }
 0x27a   : > { %850 = vpow2.f32 %v464_v39 }
 0x27e   : > { %v845_v36 = vpop.eup %844 }
 0x27f   : > { %484 = vadd.xlane.f32.xlu0 %v845_v36 }
 0x282   : > { %v847_v37 = vpop.eup %846 }
 0x283   : > { %486 = vadd.xlane.f32.xlu1 %v847_v37  ;;  %v849_v40 = vpop.eup %848 }
 0x284   : > { %v466_v42 = vmul.f32 %v849_v40, %v458_v41  ;;  %v851_v43 = vpop.eup %850 }
 0x285   : > { %v467_v47 = vmul.f32 %v851_v43, %v459_v45 }
 0x30c   : > { %v485_v44 = vpop.xlane.xlu0 %484 }
 0x30d   : > { %v488_v46 = vadd.f32 %v485_v44, %v466_v42 }
 0x30f   : > { %491 = vst.msk [vmem:[#allocation4] sm:$0xff] %vm490_vm5, %v488_v46 }
 0x310   : > { %v487_v48 = vpop.xlane.xlu1 %486 }
 0x311   : > { %v489_v49 = vadd.f32 %v487_v48, %v467_v47 }
 0x313   : > { %492 = vst.msk [vmem:[#allocation4 + $0x8] sm:$0xff] %vm490_vm5, %v489_v49 }
 0x314 PF: > { %p495_p11 = scmp.eq.s32.totalorder %s1029_s22, 1 }
 0x316   : > { %p496_p13 = pnand %p495_p11, %p348_p4 }
 0x317   : > { %v502_v50 = vld [vmem:[#allocation4] sm:$0xff] (!%p496_p13)  ;;  %v500_v53 = vld [vmem:[#allocation3] sm:$0xff] (!%p496_p13)  ;;  %v501_v56 = vld [vmem:[#allocation3 + $0x8] sm:$0xff] (!%p496_p13)  ;;  %vm510_vm6 = vcmask (!%p496_p13), 7168  }
 0x318   : > { %499 = sbr.rel (%p496_p13) target bundleno = 811 (0x32b), region = 56  ;;  %852 = vlog2.f32 (!%p496_p13), %v502_v50 }
 0x31a   : > { %v503_v51 = vld [vmem:[#allocation4 + $0x8] sm:$0xff] (!%p496_p13) }
 0x31b   : > { %854 = vlog2.f32 (!%p496_p13), %v503_v51 }
 0x322   : > { %v853_v52 = vpop.eup %852 }
 0x323   : > { %v505_v55 = vmul.f32 0.6931472, %v853_v52 }
 0x325   : > { %v855_v54 = vpop.eup %854  ;;  %v508_v58 = vadd.f32 %v505_v55, %v500_v53 }
 0x326   : > { %v507_v57 = vmul.f32 0.6931472, %v855_v54 }
 0x327   : > { %511 = vst.msk [vmem:[#allocation5] sm:$0xff] %vm510_vm6, %v508_v58 }
 0x328   : > { %v509_v59 = vadd.f32 %v507_v57, %v501_v56 }
 0x32a   : > { %512 = vst.msk [vmem:[#allocation5 + $0x8] sm:$0xff] %vm510_vm6, %v509_v59 }
 0x32b PF: > { %p697_p0 = scmp.ne.s32.totalorder %s1029_s22, 1 }
 0x32c   : > { %v1053_v61 = vmov (!%p697_p0), 0   ;;  %s698_s3 = sshll.u32 (!%p697_p0), %s1025_s21, 4 }
 0x32d   : > { %515 = sbr.rel (%p697_p0) target bundleno = 950 (0x3b6), region = 60  ;;  %856 = vset.pattern.permute.xlu0 (!%p697_p0), %v1053_v61  ;;  %s517_s7 = scalar_lea.vmem (!%p697_p0), [#allocation2], %s698_s3 }
 0x32e   : > { %v520_v60 = vld [vmem:[#allocation5] sm:$0xff] (!%p697_p0)  ;;  %v519_v2 = vld [vmem:[%s517_s7 + $0x8] sm:$0xff] (!%p697_p0) }
 0x32f   : > { %524 = vperm.xlu0 (!%p697_p0), %856, %v520_v60   ;;  %v518_v63 = vld [vmem:[%s517_s7] sm:$0xff] (!%p697_p0) }
 0x331   : > { %v521_v62 = vld [vmem:[#allocation5 + $0x8] sm:$0xff] (!%p697_p0) }
 0x333   : > { %529 = vperm.xlu0 (!%p697_p0), %856, %v521_v62  }
 0x3ae   : > { %v525_v0 = vpop.permute.xlu0 %524 }
 0x3af   : > { %v532_v1 = vsub.f32 %v518_v63, %v525_v0 }
 0x3b1   : > { %534 = vst [vmem:[%s1305_s9] sm:$0xff] %v532_v1 }
 0x3b2   : > { %v530_v3 = vpop.permute.xlu0 %529 }
 0x3b3   : > { %v533_v4 = vsub.f32 %v519_v2, %v530_v3 }
 0x3b5   : > { %535 = vst [vmem:[%s1305_s9 + $0x8] sm:$0xff] %v533_v4 }
 0x3b6 PF: > { %s1452_s13 = sld [smem:[#allocation19_spill]]  ;;  %s544_s6 = smul.u32 %s1025_s21, %s1029_s22 }
 0x3b7   : > { %s553_s12 = sshll.u32 %s1305_s9, 4  ;;  %s1453_s2 = sld [smem:[#allocation24_spill]]  ;;  %s1332_s12 = int_to_ptr.vmem [resolvable:$true] %s553_s12 }
 0x3b8   : > { %s700_s30 = sshll.u32 %s544_s6, 7  ;;  %s1341_s24 = scalar_lea.sflag [#allocation8], %s319_s27 }
 0x3b9   : > { %s915_s25 = scalar_lea.vmem %s1332_s12, 256  ;;  %s1054_s21 = smov [#allocation11]  }
 0x3ba   : > { %p916_p8 = scmp.ne.s32.totalorder %s1332_s12, %s915_s25  ;;  %s919_s22 = sshll.u32 %s1054_s21, 4  ;;  %s920_s22 = int_to_ptr.vmem [resolvable:$false] %s919_s22 }
 0x3bb   : > { %s921_s26 = scalar_lea.vmem %s920_s22, 512  ;;  %p922_p9 = scmp.lt.s32.totalorder %s1332_s12, %s920_s22 }
 0x3bc   : > { %p1454_p10 = scmp.ne.s32.totalorder %s1452_s13, 0  ;;  %p923_p1 = scmp.lt.s32.totalorder %s921_s26, %s915_s25 }
 0x3bd   : > { %s1337_s15 = scalar_lea.hbm %s1453_s2, %s700_s30 }
 0x3be   : > { %p917_p12 = pnand %p916_p8, %p1454_p10  ;;  %p924_p2 = por %p923_p1, %p922_p9 }
 0x3c0   : > { %p918_p7 = pneg %p917_p12 }
 0x3c2   : > { %p925_p4 = pnand %p924_p2, %p918_p7 }
 0x3c4   : > { %928 = shalt.err (!%p925_p4)
}
 0x3c5   : > { %s929_s27 = scalar_lea.hbm %s1337_s15, 256  ;;  %s933_s8 = scalar_lea.hbm %s1453_s2, 512 }
 0x3c6   : > { %p930_p6 = scmp.ne.s32.totalorder %s1337_s15, %s929_s27  ;;  %p934_p11 = scmp.lt.u32.totalorder %s1337_s15, %s1453_s2 }
 0x3c7   : > { %p935_p13 = scmp.lt.u32.totalorder %s933_s8, %s929_s27  ;;  %p937_p8 = scmp.lt.u32.totalorder %s929_s27, %s1337_s15 }
 0x3c8   : > { %p931_p3 = pnand %p930_p6, %p1454_p10 }
 0x3c9   : > { %p936_p0 = por %p935_p13, %p934_p11 }
 0x3ca   : > { %p932_p5 = pneg %p931_p3 }
 0x3cb   : > { %p938_p12 = por %p937_p8, %p936_p0 }
 0x3cd   : > { %p939_p7 = pnand %p938_p12, %p932_p5 }
 0x3cf   : > { %942 = shalt.err (!%p939_p7)
}
 0x3d0   : > { %s1055_s11 = smov 128   ;;  %s1056_s3 = smov 256  }
 0x3d1   : > { %s1057_s7 = smov 8  }
 0x3d2   : > { %720 = dma.vmem_to_hbm [thread:$0]  (%p1454_p10), %s1332_s12, 256, %s1337_s15, %s1341_s24, %s1055_s11, %s1056_s3, %s1057_s7  }
 0x3d3 PF: > { %s1455_s6 = sld [smem:[#allocation18_spill]]  ;;  %s1456_s30 = sld [smem:[#allocation15_spill]] }
 0x3d4   : > { %s1457_s4 = sld [smem:[#allocation20_spill]] }
 0x3d9   : > { %p737_p9 = scmp.ge.s32.totalorder %s1455_s6, 2  ;;  %s568_s23 = sand.u32 1, %s1456_s30  }
 0x3da   : > { %p1458_p1 = scmp.ne.s32.totalorder %s1457_s4, 0  ;;  %s569_s25 = scalar_lea.sflag [#allocation8], %s568_s23 }
 0x3dc   : > { %p731_p2 = pnand %p737_p9, %p1458_p1 }
 0x3de   : > { %996 = dma.done.wait (!%p731_p2), %s569_s25, 256  }
 0x3df   : > { %998 = vsyncadd (!%p731_p2), %s569_s25, 4294967040  ;;  %s21_s25 = sadd.s32 1, %s1455_s6   ;;  %s1459_s21 = sld [smem:[#allocation16_spill]] }
 0x3e0   : > { %p18_p4 = scmp.ge.s32.totalorder %s21_s25, 6   ;;  %s1460_s22 = sld [smem:[#allocation17_spill]] }
 0x3e1   : > { %s1461_s15 = smov %s1005_s16  ;;  %s1462_s16 = smov %s1009_s17 }
 0x3e2   : > { %s1463_s17 = smov %s1236_s14  ;;  %s1464_s18 = smov %s1017_s19 }
 0x3e3   : > { %s1465_s19 = smov %s1021_s20  ;;  %s1466_s20 = smov %s1239_s5 }
 0x3e4   : > { %s1467_s23 = smov %s1470_s28  ;;  %s1468_s24 = smov %s1474_s29 }
 0x3e5   :  { %20 = sbr.rel (!%p18_p4) target bundleno = 15 (0xf), region = 111 }
 0x3ec   :  { %574 = vsyncpa [#allocation7], 1 }
 0x3ed   :  { %576 = vsyncpa [#allocation7 + $0x1], 1 }
 0x3ee   :  { %577 = vsyncpa [#allocation10], 1 }
 0x3ef   :  { %579 = vsyncpa [#allocation10 + $0x1], 1 }
 0x3f0   :  { %580 = vsyncpa [#allocation8], 1 }
 0x3f1   :  { %582 = vsyncpa [#allocation8 + $0x1], 1 }

</bundles_post_ra>
